<compile_context>
chip_gen: v7x
topology: tpu7x:2x2x1
jax: 0.10.0
libtpu: 0.0.40
codegen_flags: <defaults>
</compile_context>

<pallas_src>
import functools

import jax
import jax.numpy as jnp
from jax.experimental import pallas as pl
from jax.experimental.pallas import tpu as pltpu


def _round_up(v, m):
    return ((v + m - 1) // m) * m


def _choose_tile(B, batch_tile):
    """Pick a batch tile: sublane-safe, MXU-friendly, and >=2 grid steps when possible."""
    # 16-row alignment is sublane-safe for both the f32 input block and the
    # bf16 output block; 256 fills full MXU rows on v6e/v7x for large batches.
    align = 16 if B <= 512 else 256
    if B <= align:
        return _round_up(B, align)
    # Aim for at least two grid steps so v7x's two TensorCores both get work.
    half = _round_up((B + 1) // 2, align)
    tile = min(_round_up(batch_tile, align), half)
    return max(tile, align)


def _mlp_kernel(x_ref,
                w1_ref, b1_ref,
                w2_ref, b2_ref,
                w3_ref, b3_ref,
                w4_ref, b4_ref,
                o_ref):
    # Cast x to the compute dtype (bf16) in-kernel; input stays f32 in HBM but
    # at its real (un-padded) feature width.
    x = x_ref[...].astype(w1_ref.dtype)

    h = jnp.dot(x, w1_ref[...],
                preferred_element_type=jnp.float32) + b1_ref[...]
    h = jnp.maximum(h, 0.0)

    h = jnp.dot(h.astype(w2_ref.dtype), w2_ref[...],
                preferred_element_type=jnp.float32) + b2_ref[...]
    h = jnp.maximum(h, 0.0)

    h = jnp.dot(h.astype(w3_ref.dtype), w3_ref[...],
                preferred_element_type=jnp.float32) + b3_ref[...]
    h = jnp.maximum(h, 0.0)

    h = jnp.dot(h.astype(w4_ref.dtype), w4_ref[...],
                preferred_element_type=jnp.float32) + b4_ref[...]

    o_ref[...] = h.astype(o_ref.dtype)  # bf16, lane-dense (out_pad = 128)


def prepare_params(params, compute_dtype=jnp.bfloat16):
    """One-time preprocessing: bf16 weight cast + zero-padding (reuse across calls)."""
    (w1, b1), (w2, b2), (w3, b3), (w4, b4) = params
    num_classes = w4.shape[1]
    hid3 = w3.shape[1]                       # 64
    hid3_pad = _round_up(hid3, 128)          # lane-dense layer-3 activation
    out_pad = _round_up(num_classes, 128)    # lane-dense output block

    w1c = w1.astype(compute_dtype)
    w2c = w2.astype(compute_dtype)
    w3p = jnp.zeros((w3.shape[0], hid3_pad), compute_dtype)
    w3p = w3p.at[:, :hid3].set(w3.astype(compute_dtype))
    w4p = jnp.zeros((hid3_pad, out_pad), compute_dtype)
    w4p = w4p.at[:hid3, :num_classes].set(w4.astype(compute_dtype))

    b1c = b1.astype(jnp.float32)
    b2c = b2.astype(jnp.float32)
    b3p = jnp.zeros((1, hid3_pad), jnp.float32)
    b3p = b3p.at[:, :hid3].set(b3.astype(jnp.float32))
    b4p = jnp.zeros((1, out_pad), jnp.float32)
    b4p = b4p.at[:, :num_classes].set(b4.astype(jnp.float32))

    # All padding is exact: padded ReLU outputs are 0 and padded w4 rows are 0.
    return (w1c, b1c, w2c, b2c, w3p, b3p, w4p, b4p)


@functools.partial(jax.jit, static_argnames=("num_classes", "batch_tile"))
def deep_nn_forward(x, prepared, num_classes, batch_tile=2048):
    """Fused MLP forward.  x: (B, input_size) f32.  Returns (B, num_classes) f32."""
    w1, b1, w2, b2, w3, b3, w4, b4 = prepared
    B, in_dim = x.shape
    out_pad = w4.shape[1]

    tile = _choose_tile(B, batch_tile)
    B_pad = _round_up(B, tile)
    if B_pad != B:
        x = jnp.pad(x, ((0, B_pad - B), (0, 0)))   # batch-row padding only

    grid = (B_pad // tile,)

    # Grid-invariant (resident) blocks: constant index_map -> no per-step DMA.
    def resident(shape):
        return pl.BlockSpec(shape, lambda i: (0, 0))

    out = pl.pallas_call(
        _mlp_kernel,
        out_shape=jax.ShapeDtypeStruct((B_pad, out_pad), jnp.bfloat16),
        grid_spec=pltpu.PrefetchScalarGridSpec(
            num_scalar_prefetch=0,
            grid=grid,
            in_specs=[
                # last dim == full array dim (32), so no 128-divisibility needed
                pl.BlockSpec((tile, in_dim), lambda i: (i, 0)),
                resident(w1.shape), resident(b1.shape),
                resident(w2.shape), resident(b2.shape),
                resident(w3.shape), resident(b3.shape),
                resident(w4.shape), resident(b4.shape),
            ],
            out_specs=pl.BlockSpec((tile, out_pad), lambda i: (i, 0)),
        ),
        compiler_params=pltpu.CompilerParams(
            dimension_semantics=("parallel",),
            vmem_limit_bytes=32 * 1024 * 1024,
        ),
    )(x, w1, b1, w2, b2, w3, b3, w4, b4)

    # Strip batch / class padding; cast to f32 for downstream consumers.
    # TODO(synk): fuse this slice/cast into the consumer to avoid an extra HBM copy.
    return out[:B, :num_classes].astype(jnp.float32)


def init_params(key, input_size, num_classes):
    """Deterministic init mimicking nn.Linear default (U(-1/sqrt(in), 1/sqrt(in)))."""
    dims = [(input_size, 256), (256, 128), (128, 64), (64, num_classes)]
    params = []
    for (fan_in, fan_out) in dims:
        key, kw, kb = jax.random.split(key, 3)
        bound = 1.0 / jnp.sqrt(float(fan_in))
        w = jax.random.uniform(kw, (fan_in, fan_out), jnp.float32, -bound, bound)
        b = jax.random.uniform(kb, (1, fan_out), jnp.float32, -bound, bound)
        params.append((w, b))
    return params


def reference_forward(x, params, compute_dtype=jnp.bfloat16):
    """Pure-JAX reference mirroring the kernel's dtype policy (bf16 matmuls/output, f32 accum)."""
    h = x.astype(compute_dtype)
    for i, (w, b) in enumerate(params):
        h = jnp.dot(h, w.astype(compute_dtype),
                    preferred_element_type=jnp.float32) + b
        if i < len(params) - 1:
            h = jnp.maximum(h, 0.0).astype(compute_dtype)
    # kernel writes its output block in bf16
    return h.astype(compute_dtype).astype(jnp.float32)


if __name__ == "__main__":
    key = jax.random.PRNGKey(0)
    key, kx = jax.random.split(key)

    batch = 8
    input_size = 32
    num_classes = 10

    x = jax.random.normal(kx, (batch, input_size), jnp.float32)
    params = init_params(key, input_size, num_classes)
    prepared = prepare_params(params)

    out = deep_nn_forward(x, prepared, num_classes)
    out = jax.block_until_ready(out)

    ref = reference_forward(x, params)
    assert out.shape == (batch, num_classes), out.shape
    assert jnp.allclose(out, ref, atol=1e-2, rtol=1e-2), "mismatch vs reference"

    print("KERNEL_OK")
</pallas_src>

<mosaic_0001>
module attributes {stable_mosaic.version = 11 : i64} {
  func.func @_mlp_kernel(%arg0: i32, %arg1: memref<16x32xf32, #tpu.memory_space<vmem>>, %arg2: memref<32x256xbf16, #tpu.memory_space<vmem>>, %arg3: memref<1x256xf32, #tpu.memory_space<vmem>>, %arg4: memref<256x128xbf16, #tpu.memory_space<vmem>>, %arg5: memref<1x128xf32, #tpu.memory_space<vmem>>, %arg6: memref<128x128xbf16, #tpu.memory_space<vmem>>, %arg7: memref<1x128xf32, #tpu.memory_space<vmem>>, %arg8: memref<128x128xbf16, #tpu.memory_space<vmem>>, %arg9: memref<1x128xf32, #tpu.memory_space<vmem>>, %arg10: memref<16x128xbf16, #tpu.memory_space<vmem>>) attributes {dimension_semantics = [#tpu.dimension_semantics<parallel>], iteration_bounds = array<i64: 1>, scalar_prefetch = 0 : i64, scratch_operands = 0 : i64, tpu.core_type = #tpu.core_type<tc>, window_params = [{transform_indices = @transform_0, window_bounds = array<i64: 16, 32>}, {pipeline_mode = #tpu.pipeline_mode<synchronous>, transform_indices = @transform_1, window_bounds = array<i64: 32, 256>}, {pipeline_mode = #tpu.pipeline_mode<synchronous>, transform_indices = @transform_2, window_bounds = array<i64: 1, 256>}, {pipeline_mode = #tpu.pipeline_mode<synchronous>, transform_indices = @transform_3, window_bounds = array<i64: 256, 128>}, {pipeline_mode = #tpu.pipeline_mode<synchronous>, transform_indices = @transform_4, window_bounds = array<i64: 1, 128>}, {pipeline_mode = #tpu.pipeline_mode<synchronous>, transform_indices = @transform_5, window_bounds = array<i64: 128, 128>}, {pipeline_mode = #tpu.pipeline_mode<synchronous>, transform_indices = @transform_6, window_bounds = array<i64: 1, 128>}, {pipeline_mode = #tpu.pipeline_mode<synchronous>, transform_indices = @transform_7, window_bounds = array<i64: 128, 128>}, {pipeline_mode = #tpu.pipeline_mode<synchronous>, transform_indices = @transform_8, window_bounds = array<i64: 1, 128>}, {transform_indices = @transform_9, window_bounds = array<i64: 16, 128>}]} {
    %c0 = arith.constant 0 : index
    %c0_0 = arith.constant 0 : index
    %0 = vector.load %arg1[%c0, %c0_0] : memref<16x32xf32, #tpu.memory_space<vmem>>, vector<16x32xf32>
    %1 = arith.truncf %0 : vector<16x32xf32> to vector<16x32xbf16>
    %c0_1 = arith.constant 0 : index
    %c0_2 = arith.constant 0 : index
    %2 = vector.load %arg2[%c0_1, %c0_2] : memref<32x256xbf16, #tpu.memory_space<vmem>>, vector<32x256xbf16>
    %cst = arith.constant dense<0.000000e+00> : vector<16x256xf32>
    %3 = tpu.matmul %1, %2, %cst {dimension_numbers = #tpu.dot_dimension_numbers<[1], [0], [0], [1], [0, 0, 1, 1], [], []>} : vector<16x32xbf16>, vector<32x256xbf16>, vector<16x256xf32> -> vector<16x256xf32>
    %c0_3 = arith.constant 0 : index
    %c0_4 = arith.constant 0 : index
    %4 = vector.load %arg3[%c0_3, %c0_4] : memref<1x256xf32, #tpu.memory_space<vmem>>, vector<1x256xf32>
    %5 = vector.broadcast %4 : vector<1x256xf32> to vector<16x256xf32>
    %6 = arith.addf %3, %5 : vector<16x256xf32>
    %cst_5 = arith.constant 0.000000e+00 : f32
    %7 = vector.broadcast %cst_5 : f32 to vector<16x256xf32>
    %8 = arith.maximumf %6, %7 : vector<16x256xf32>
    %9 = arith.truncf %8 : vector<16x256xf32> to vector<16x256xbf16>
    %c0_6 = arith.constant 0 : index
    %c0_7 = arith.constant 0 : index
    %10 = vector.load %arg4[%c0_6, %c0_7] : memref<256x128xbf16, #tpu.memory_space<vmem>>, vector<256x128xbf16>
    %cst_8 = arith.constant dense<0.000000e+00> : vector<16x128xf32>
    %11 = tpu.matmul %9, %10, %cst_8 {dimension_numbers = #tpu.dot_dimension_numbers<[1], [0], [0], [1], [0, 0, 1, 1], [], []>} : vector<16x256xbf16>, vector<256x128xbf16>, vector<16x128xf32> -> vector<16x128xf32>
    %c0_9 = arith.constant 0 : index
    %c0_10 = arith.constant 0 : index
    %12 = vector.load %arg5[%c0_9, %c0_10] : memref<1x128xf32, #tpu.memory_space<vmem>>, vector<1x128xf32>
    %13 = vector.broadcast %12 : vector<1x128xf32> to vector<16x128xf32>
    %14 = arith.addf %11, %13 : vector<16x128xf32>
    %cst_11 = arith.constant 0.000000e+00 : f32
    %15 = vector.broadcast %cst_11 : f32 to vector<16x128xf32>
    %16 = arith.maximumf %14, %15 : vector<16x128xf32>
    %17 = arith.truncf %16 : vector<16x128xf32> to vector<16x128xbf16>
    %c0_12 = arith.constant 0 : index
    %c0_13 = arith.constant 0 : index
    %18 = vector.load %arg6[%c0_12, %c0_13] : memref<128x128xbf16, #tpu.memory_space<vmem>>, vector<128x128xbf16>
    %cst_14 = arith.constant dense<0.000000e+00> : vector<16x128xf32>
    %19 = tpu.matmul %17, %18, %cst_14 {dimension_numbers = #tpu.dot_dimension_numbers<[1], [0], [0], [1], [0, 0, 1, 1], [], []>} : vector<16x128xbf16>, vector<128x128xbf16>, vector<16x128xf32> -> vector<16x128xf32>
    %c0_15 = arith.constant 0 : index
    %c0_16 = arith.constant 0 : index
    %20 = vector.load %arg7[%c0_15, %c0_16] : memref<1x128xf32, #tpu.memory_space<vmem>>, vector<1x128xf32>
    %21 = vector.broadcast %20 : vector<1x128xf32> to vector<16x128xf32>
    %22 = arith.addf %19, %21 : vector<16x128xf32>
    %cst_17 = arith.constant 0.000000e+00 : f32
    %23 = vector.broadcast %cst_17 : f32 to vector<16x128xf32>
    %24 = arith.maximumf %22, %23 : vector<16x128xf32>
    %25 = arith.truncf %24 : vector<16x128xf32> to vector<16x128xbf16>
    %c0_18 = arith.constant 0 : index
    %c0_19 = arith.constant 0 : index
    %26 = vector.load %arg8[%c0_18, %c0_19] : memref<128x128xbf16, #tpu.memory_space<vmem>>, vector<128x128xbf16>
    %cst_20 = arith.constant dense<0.000000e+00> : vector<16x128xf32>
    %27 = tpu.matmul %25, %26, %cst_20 {dimension_numbers = #tpu.dot_dimension_numbers<[1], [0], [0], [1], [0, 0, 1, 1], [], []>} : vector<16x128xbf16>, vector<128x128xbf16>, vector<16x128xf32> -> vector<16x128xf32>
    %c0_21 = arith.constant 0 : index
    %c0_22 = arith.constant 0 : index
    %28 = vector.load %arg9[%c0_21, %c0_22] : memref<1x128xf32, #tpu.memory_space<vmem>>, vector<1x128xf32>
    %29 = vector.broadcast %28 : vector<1x128xf32> to vector<16x128xf32>
    %30 = arith.addf %27, %29 : vector<16x128xf32>
    %31 = arith.truncf %30 : vector<16x128xf32> to vector<16x128xbf16>
    %c0_23 = arith.constant 0 : index
    %c0_24 = arith.constant 0 : index
    %32 = vector.load %arg10[%c0_23, %c0_24] : memref<16x128xbf16, #tpu.memory_space<vmem>>, vector<16x128xbf16>
    tpu.vector_store %arg10[%c0_23, %c0_24], %31 {strides = array<i32>} : memref<16x128xbf16, #tpu.memory_space<vmem>>, vector<16x128xbf16>,
    return
  }
  func.func @transform_0(%arg0: i32) -> (i32, i32) {
    %c0_i32 = arith.constant 0 : i32
    %c0_i32_0 = arith.constant 0 : i32
    return %arg0, %c0_i32 : i32, i32
  }
  func.func @transform_1(%arg0: i32) -> (i32, i32) {
    %c0_i32 = arith.constant 0 : i32
    %c0_i32_0 = arith.constant 0 : i32
    %c0_i32_1 = arith.constant 0 : i32
    return %c0_i32, %c0_i32_0 : i32, i32
  }
  func.func @transform_2(%arg0: i32) -> (i32, i32) {
    %c0_i32 = arith.constant 0 : i32
    %c0_i32_0 = arith.constant 0 : i32
    %c0_i32_1 = arith.constant 0 : i32
    return %c0_i32, %c0_i32_0 : i32, i32
  }
  func.func @transform_3(%arg0: i32) -> (i32, i32) {
    %c0_i32 = arith.constant 0 : i32
    %c0_i32_0 = arith.constant 0 : i32
    %c0_i32_1 = arith.constant 0 : i32
    return %c0_i32, %c0_i32_0 : i32, i32
  }
  func.func @transform_4(%arg0: i32) -> (i32, i32) {
    %c0_i32 = arith.constant 0 : i32
    %c0_i32_0 = arith.constant 0 : i32
    %c0_i32_1 = arith.constant 0 : i32
    return %c0_i32, %c0_i32_0 : i32, i32
  }
  func.func @transform_5(%arg0: i32) -> (i32, i32) {
    %c0_i32 = arith.constant 0 : i32
    %c0_i32_0 = arith.constant 0 : i32
    %c0_i32_1 = arith.constant 0 : i32
    return %c0_i32, %c0_i32_0 : i32, i32
  }
  func.func @transform_6(%arg0: i32) -> (i32, i32) {
    %c0_i32 = arith.constant 0 : i32
    %c0_i32_0 = arith.constant 0 : i32
    %c0_i32_1 = arith.constant 0 : i32
    return %c0_i32, %c0_i32_0 : i32, i32
  }
  func.func @transform_7(%arg0: i32) -> (i32, i32) {
    %c0_i32 = arith.constant 0 : i32
    %c0_i32_0 = arith.constant 0 : i32
    %c0_i32_1 = arith.constant 0 : i32
    return %c0_i32, %c0_i32_0 : i32, i32
  }
  func.func @transform_8(%arg0: i32) -> (i32, i32) {
    %c0_i32 = arith.constant 0 : i32
    %c0_i32_0 = arith.constant 0 : i32
    %c0_i32_1 = arith.constant 0 : i32
    return %c0_i32, %c0_i32_0 : i32, i32
  }
  func.func @transform_9(%arg0: i32) -> (i32, i32) {
    %c0_i32 = arith.constant 0 : i32
    %c0_i32_0 = arith.constant 0 : i32
    return %arg0, %c0_i32 : i32, i32
  }
}

</mosaic_0001>

<bundles_post_ra>
// kernel: deep_nn_forward.1
= control target key start
LH: loop header
LB: loop body
LE: loop exit
PB: predicated region body
PF: predicated region fallthrough
CT: control target
= control target key end

     0   :  { %14 = vsyncpa [#allocation3], 0  ;;  %s1039_s0 = inlined_call_operand.vmem [shape: f32[16,32], index: 0, kind: input, shape index: {}]   ;;  %s1040_s1 = inlined_call_operand.hbm [shape: bf16[32,256], index: 1, kind: input, shape index: {}]   ;;  %s1041_s2 = inlined_call_operand.vmem [shape: f32[1,256], index: 2, kind: input, shape index: {}]   ;;  %s1042_s3 = inlined_call_operand.hbm [shape: bf16[256,128], index: 3, kind: input, shape index: {}]   ;;  %s1043_s4 = inlined_call_operand.vmem [shape: f32[1,128], index: 4, kind: input, shape index: {}]   ;;  %s1044_s5 = inlined_call_operand.hbm [shape: bf16[128,128], index: 5, kind: input, shape index: {}]   ;;  %s1045_s6 = inlined_call_operand.vmem [shape: f32[1,128], index: 6, kind: input, shape index: {}]   ;;  %s1046_s7 = inlined_call_operand.hbm [shape: bf16[128,128], index: 7, kind: input, shape index: {}]   ;;  %s1047_s8 = inlined_call_operand.vmem [shape: f32[1,128], index: 8, kind: input, shape index: {}]   ;;  %s1048_s9 = inlined_call_operand.vmem [shape: bf16[16,128], index: 9, kind: output, shape index: {}]  }
   0x1   :  { %15 = vsyncpa [#allocation5], 0 }
   0x2   :  { %16 = vsyncpa [#allocation8], 0  ;;  %s875_s30 = smov [#allocation4]   ;;  %s781_s13 = scalar_lea.hbm %s1042_s3, 2048 }
   0x3   :  { %s38_s10 = sshll.u32 %s875_s30, 4  ;;  %p782_p0 = scmp.ne.s32.totalorder %s1042_s3, %s781_s13  ;;  %s39_s10 = int_to_ptr.vmem [resolvable:$true] %s38_s10 }
   0x4   :  { %p785_p1 = scmp.lt.u32.totalorder %s781_s13, %s1042_s3 }
   0x6   :  { %p787_p2 = pnand %p785_p1, %p782_p0 }
   0x8   :  { %790 = shalt.err (!%p787_p2)
}
   0x9   :  { %s791_s18 = scalar_lea.vmem %s39_s10, 2048  ;;  %p796_p4 = scmp.lt.s32.totalorder %s39_s10, %s39_s10 }
   0xa   :  { %p792_p3 = scmp.ne.s32.totalorder %s39_s10, %s791_s18  ;;  %p797_p5 = scmp.lt.s32.totalorder %s791_s18, %s791_s18 }
   0xc   :  { %p798_p6 = por %p797_p5, %p796_p4 }
   0xe   :  { %p799_p7 = pnand %p798_p6, %p792_p3 }
  0x10   :  { %802 = shalt.err (!%p799_p7)
}
  0x11   :  { %s876_s19 = smov 64   ;;  %s877_s20 = smov 4  }
  0x12   :  { %44 = dma.hbm_to_vmem [thread:$0]  %s1042_s3, 2048, %s39_s10, [#allocation5], %s876_s19, %s876_s19, %s877_s20  }
  0x13   :  { %s878_s23 = smov [#allocation2]   ;;  %s803_s27 = scalar_lea.hbm %s1040_s1, 512 }
  0x14   :  { %s24_s24 = sshll.u32 %s878_s23, 4  ;;  %p804_p8 = scmp.ne.s32.totalorder %s1040_s1, %s803_s27  ;;  %s25_s24 = int_to_ptr.vmem [resolvable:$true] %s24_s24 }
  0x15   :  { %p807_p9 = scmp.lt.u32.totalorder %s803_s27, %s1040_s1 }
  0x17   :  { %p809_p10 = pnand %p807_p9, %p804_p8 }
  0x19   :  { %812 = shalt.err (!%p809_p10)
}
  0x1a   :  { %s813_s12 = scalar_lea.vmem %s25_s24, 512  ;;  %p818_p12 = scmp.lt.s32.totalorder %s25_s24, %s25_s24 }
  0x1b   :  { %p814_p11 = scmp.ne.s32.totalorder %s25_s24, %s813_s12  ;;  %p819_p13 = scmp.lt.s32.totalorder %s813_s12, %s813_s12 }
  0x1d   :  { %p820_p0 = por %p819_p13, %p818_p12 }
  0x1f   :  { %p821_p1 = pnand %p820_p0, %p814_p11 }
  0x21   :  { %824 = shalt.err (!%p821_p1)
}
  0x22   :  { %s879_s3 = smov 128   ;;  %s880_s10 = smov 8  }
  0x23   :  { %30 = dma.hbm_to_vmem [thread:$0]  %s1040_s1, 512, %s25_s24, [#allocation3], %s879_s3, %s879_s3, %s880_s10  }
  0x24   :  { %s881_s15 = smov [#allocation6]   ;;  %s882_s17 = smov [#allocation7]  }
  0x25   :  { %s52_s16 = sshll.u32 %s881_s15, 4  ;;  %s66_s18 = sshll.u32 %s882_s17, 4  ;;  %s53_s16 = int_to_ptr.vmem [resolvable:$true] %s52_s16  ;;  %s963_s18 = int_to_ptr.vmem [resolvable:$true] %s66_s18 }
  0x26   :  { %s825_s23 = scalar_lea.hbm %s1044_s5, 1024 }
  0x27   :  { %p826_p2 = scmp.ne.s32.totalorder %s1044_s5, %s825_s23  ;;  %p829_p3 = scmp.lt.u32.totalorder %s825_s23, %s1044_s5 }
  0x29   :  { %p831_p4 = pnand %p829_p3, %p826_p2 }
  0x2b   :  { %834 = shalt.err (!%p831_p4)
}
  0x2c   :  { %s835_s1 = scalar_lea.vmem %s53_s16, 1024  ;;  %p840_p6 = scmp.lt.s32.totalorder %s53_s16, %s53_s16 }
  0x2d   :  { %p836_p5 = scmp.ne.s32.totalorder %s53_s16, %s835_s1  ;;  %p841_p7 = scmp.lt.s32.totalorder %s835_s1, %s835_s1 }
  0x2f   :  { %p842_p8 = por %p841_p7, %p840_p6 }
  0x31   :  { %p843_p9 = pnand %p842_p8, %p836_p5 }
  0x33   :  { %846 = shalt.err (!%p843_p9)
}
  0x34   :  { %58 = dma.hbm_to_vmem [thread:$0]  %s1044_s5, 1024, %s53_s16, [#allocation5], %s876_s19, %s876_s19, %s877_s20  }
  0x35   :  { %s847_s12 = scalar_lea.hbm %s1046_s7, 1024 }
  0x36   :  { %p848_p10 = scmp.ne.s32.totalorder %s1046_s7, %s847_s12  ;;  %p851_p11 = scmp.lt.u32.totalorder %s847_s12, %s1046_s7 }
  0x38   :  { %p853_p12 = pnand %p851_p11, %p848_p10 }
  0x3a   :  { %856 = shalt.err (!%p853_p12)
}
  0x3b   :  { %s857_s15 = scalar_lea.vmem %s963_s18, 1024  ;;  %p862_p0 = scmp.lt.s32.totalorder %s963_s18, %s963_s18 }
  0x3c   :  { %p858_p13 = scmp.ne.s32.totalorder %s963_s18, %s857_s15  ;;  %p863_p1 = scmp.lt.s32.totalorder %s857_s15, %s857_s15 }
  0x3e   :  { %p864_p2 = por %p863_p1, %p862_p0 }
  0x40   :  { %p865_p3 = pnand %p864_p2, %p858_p13 }
  0x42   :  { %868 = shalt.err (!%p865_p3)
}
  0x43   :  { %72 = dma.hbm_to_vmem [thread:$0]  %s1046_s7, 1024, %s963_s18, [#allocation8], %s876_s19, %s876_s19, %s877_s20  }
  0x44   :  { %869 = dma.done.wait [#allocation3], 512  }
  0x45   :  { %870 = vsyncadd [#allocation3], 4294966784 }
  0x46   :  { %871 = dma.done.wait [#allocation5], 3072  }
  0x47   :  { %872 = vsyncadd [#allocation5], 4294964224 }
  0x48   :  { %873 = dma.done.wait [#allocation8], 1024  }
  0x49   :  { %874 = vsyncadd [#allocation8], 4294966272  ;;  %v883_v0 = vmov 0   ;;  %v743_v1 = vld [vmem:[#allocation2 + $0x4] ss:$8 sps:$4 sm:$0xff]   ;;  %vm127_vm0 = vcmask 261120   ;;  %v97_v30 = vlaneseq }
  0x4a   :  { %163 = vmatprep.mubr.bf16.mxu0 %v883_v0  ;;  %v745_v2 = vld [vmem:[#allocation2] ss:$8 sps:$4 sm:$0xff]   ;;  %131 = vmatprep.subr.bf16.mxu0 %v743_v1  ;;  %v746_v3 = vld [vmem:[#allocation2 + $0x14] ss:$8 sps:$4 sm:$0xff]   ;;  %v748_v4 = vld [vmem:[#allocation2 + $0x10] ss:$8 sps:$4 sm:$0xff]  }
  0x4b   :  { %v88_v5 = vld [vmem:[%s1039_s0] sm:$0xff]  ;;  %132 = vmatpush1.bf16.msra.mxu0 %v745_v2  ;;  %v89_v6 = vld [vmem:[%s1039_s0 + $0x8] sm:$0xff]  ;;  %v753_v12 = vld [vmem:[#allocation4 + $0x50] sm:$0xff]   ;;  %v884_v25 = vmov 0.0   ;;  %v98_v31 = vshrl.u32 %v97_v30, 7  ;;  %vm885_vm1 = vmmov 0  }
  0x4c   :  { %133 = vmatprep.subr.bf16.mxu0 %v746_v3  ;;  %v749_v7 = vld [vmem:[#allocation4 + $0x40] sm:$0xff]   ;;  %v90_v9 = vpack.c.bf16 %v89_v6, %v88_v5  ;;  %v751_v10 = vld [vmem:[#allocation4 + $0x48] sm:$0xff]   ;;  %v754_v13 = vld [vmem:[#allocation4 + $0x10] sm:$0xff]  }
  0x4d   :  { %v750_v8 = vld [vmem:[#allocation4] sm:$0xff]   ;;  %652 = vmatprep.subr.bf16.mxu1 %v749_v7  ;;  %v752_v11 = vld [vmem:[#allocation4 + $0x8] sm:$0xff]   ;;  %v755_v14 = vld [vmem:[#allocation4 + $0x58] sm:$0xff]   ;;  %v99_v32 = vsub.s32 0, %v98_v31  ;;  %v103_v34 = vsub.s32 1, %v98_v31 }
  0x4e   :  { %653 = vmatpush3.bf16.msra.mxu1 %v750_v8  ;;  %v756_v15 = vld [vmem:[#allocation4 + $0x18] sm:$0xff]   ;;  %v757_v16 = vld [vmem:[#allocation4 + $0x60] sm:$0xff]   ;;  %v759_v18 = vld [vmem:[#allocation4 + $0x68] sm:$0xff]  }
  0x4f   :  { %134 = vmatpush1.bf16.msra.mxu0 %v748_v4  ;;  %654 = vmatprep.subr.bf16.mxu1 %v751_v10  ;;  %v758_v17 = vld [vmem:[#allocation4 + $0x20] sm:$0xff]   ;;  %v760_v19 = vld [vmem:[#allocation4 + $0x28] sm:$0xff]   ;;  %v761_v20 = vld [vmem:[#allocation4 + $0x70] sm:$0xff]  }
  0x50   :  { %v762_v21 = vld [vmem:[#allocation4 + $0x30] sm:$0xff]   ;;  %v763_v22 = vld [vmem:[#allocation4 + $0x78] sm:$0xff]   ;;  %v765_v24 = vld [vmem:[#allocation6] sm:$0xff]   ;;  %692 = vmatprep.subr.bf16.mxu0 %v884_v25 }
  0x51   :  { %v764_v23 = vld [vmem:[#allocation4 + $0x38] sm:$0xff]   ;;  %v766_v26 = vld [vmem:[#allocation6 + $0x8] sm:$0xff]   ;;  %v767_v27 = vld [vmem:[#allocation6 + $0x10] sm:$0xff]  }
  0x52   :  { %607 = vmatmul.mubr.msk.bf16.vlgmr.msra.gmra.mrb[0].mxu0 %vm127_vm0, %v90_v9  ;;  %655 = vmatpush3.bf16.msra.mxu1 %v752_v11  ;;  %v768_v28 = vld [vmem:[#allocation6 + $0x18] sm:$0xff]   ;;  %v769_v29 = vld [vmem:[#allocation6 + $0x20] sm:$0xff]   ;;  %v770_v51 = vld [vmem:[#allocation6 + $0x28] sm:$0xff]  }
  0x53   :  { %656 = vmatprep.subr.bf16.mxu1 %v753_v12  ;;  %693 = vmatpush3.bf16.msra.mxu0 %v765_v24  ;;  %v95_v33 = vld [vmem:[%s1041_s2] sm:$0x3]  ;;  %v771_v52 = vld [vmem:[#allocation6 + $0x30] sm:$0xff]   ;;  %v772_v53 = vld [vmem:[#allocation6 + $0x38] sm:$0xff]  }
  0x54   :  { %694 = vmatprep.subr.bf16.mxu0 %v884_v25  ;;  %v100_v35 = vrot.slane %v95_v33, %v99_v32  ;;  %v104_v36 = vrot.slane %v95_v33, %v103_v34  ;;  %708 = vmatprep.mubr.msk.bf16.mxu0 %vm885_vm1, %v884_v25  ;;  %v773_v54 = vld [vmem:[#allocation7] sm:$0xff]   ;;  %v774_v55 = vld [vmem:[#allocation7 + $0x8] sm:$0xff]   ;;  %v775_v56 = vld [vmem:[#allocation7 + $0x10] sm:$0xff]  }
  0x55   :  { %v776_v57 = vld [vmem:[#allocation7 + $0x18] sm:$0xff]   ;;  %v777_v58 = vld [vmem:[#allocation7 + $0x20] sm:$0xff]   ;;  %v778_v59 = vld [vmem:[#allocation7 + $0x28] sm:$0xff]  }
  0x56   :  { %657 = vmatpush3.bf16.msra.mxu1 %v754_v13  ;;  %v608_v61 = vld [vmem:[%s1043_s4] ss:$0 sm:$0xff]  ;;  %v779_v8 = vld [vmem:[#allocation7 + $0x30] sm:$0xff]   ;;  %v780_v9 = vld [vmem:[#allocation7 + $0x38] sm:$0xff]  }
  0x57   :  { %658 = vmatprep.subr.bf16.mxu1 %v755_v14  ;;  %695 = vmatpush3.bf16.msra.mxu0 %v766_v26  ;;  %v625_v10 = vld [vmem:[%s1045_s6] ss:$0 sm:$0xff] }
  0x58   :  { %696 = vmatprep.subr.bf16.mxu0 %v884_v25 }
  0x5a   :  { %659 = vmatpush3.bf16.msra.mxu1 %v756_v15 }
  0x5b   :  { %660 = vmatprep.subr.bf16.mxu1 %v757_v16  ;;  %697 = vmatpush3.bf16.msra.mxu0 %v767_v27 }
  0x5c   :  { %698 = vmatprep.subr.bf16.mxu0 %v884_v25 }
  0x5e   :  { %661 = vmatpush3.bf16.msra.mxu1 %v758_v17 }
  0x5f   :  { %662 = vmatprep.subr.bf16.mxu1 %v759_v18  ;;  %699 = vmatpush3.bf16.msra.mxu0 %v768_v28 }
  0x60   :  { %700 = vmatprep.subr.bf16.mxu0 %v884_v25 }
  0x62   :  { %663 = vmatpush3.bf16.msra.mxu1 %v760_v19 }
  0x63   :  { %664 = vmatprep.subr.bf16.mxu1 %v761_v20  ;;  %701 = vmatpush3.bf16.msra.mxu0 %v769_v29  ;;  %v634_v20 = vld [vmem:[%s1047_s8] ss:$0 sm:$0xff] }
  0x64   :  { %702 = vmatprep.subr.bf16.mxu0 %v884_v25 }
  0x66   :  { %665 = vmatpush3.bf16.msra.mxu1 %v762_v21 }
  0x67   :  { %666 = vmatprep.subr.bf16.mxu1 %v763_v22  ;;  %703 = vmatpush3.bf16.msra.mxu0 %v770_v51 }
  0x68   :  { %704 = vmatprep.subr.bf16.mxu0 %v884_v25 }
  0x6a   :  { %667 = vmatpush3.bf16.msra.mxu1 %v764_v23 }
  0x6b   :  { %712 = vmatprep.subr.bf16.mxu1 %v884_v25  ;;  %705 = vmatpush3.bf16.msra.mxu0 %v771_v52 }
  0x6c   :  { %706 = vmatprep.subr.bf16.mxu0 %v884_v25 }
  0x6f   :  { %707 = vmatpush3.bf16.msra.mxu0 %v772_v53 }
 0x125   :  { %v165_v37 = vpop.f32.mrb[0].mxu0 }
 0x126   :  { %v166_v38 = vadd.f32 %v165_v37, %v100_v35  ;;  %v167_v39 = vpop.f32.mrb[1].mxu0 }
 0x127   :  { %v168_v40 = vadd.f32 %v167_v39, %v104_v36  ;;  %v169_v41 = vpop.f32.mrb[2].mxu0 }
 0x128   :  { %v170_v42 = vadd.f32 %v169_v41, %v100_v35  ;;  %v171_v43 = vpop.f32.mrb[3].mxu0  ;;  %v174_v45 = vmax.f32 %v166_v38, 0.0 }
 0x129   :  { %v172_v44 = vadd.f32 %v171_v43, %v104_v36  ;;  %v175_v47 = vmax.f32 %v168_v40, 0.0 }
 0x12a   :  { %v176_v46 = vmax.f32 %v170_v42, 0.0 }
 0x12b   :  { %v177_v48 = vmax.f32 %v172_v44, 0.0 }
 0x12c   :  { %v178_v49 = vpack.c.bf16 %v176_v46, %v174_v45 }
 0x12d   :  { %v179_v50 = vpack.c.bf16 %v177_v48, %v175_v47 }
 0x12f   :  { %347 = vmatprep.mubr.bf16.mxu1 %v179_v50 }
 0x130   :  { %348 = vmatmul.mubr.bf16.vlgmr.msra.gmra.mrb[0].mxu1 %v178_v49 }
 0x131   :  { %728 = vmatprep.mubr.msk.bf16.mxu1 %vm885_vm1, %v884_v25  ;;  %713 = vmatpush3.bf16.msra.mxu1 %v773_v54 }
 0x132   :  { %714 = vmatprep.subr.bf16.mxu1 %v884_v25 }
 0x135   :  { %715 = vmatpush3.bf16.msra.mxu1 %v774_v55 }
 0x136   :  { %716 = vmatprep.subr.bf16.mxu1 %v884_v25 }
 0x139   :  { %717 = vmatpush3.bf16.msra.mxu1 %v775_v56 }
 0x13a   :  { %718 = vmatprep.subr.bf16.mxu1 %v884_v25 }
 0x13d   :  { %719 = vmatpush3.bf16.msra.mxu1 %v776_v57 }
 0x13e   :  { %720 = vmatprep.subr.bf16.mxu1 %v884_v25 }
 0x141   :  { %721 = vmatpush3.bf16.msra.mxu1 %v777_v58 }
 0x142   :  { %722 = vmatprep.subr.bf16.mxu1 %v884_v25 }
 0x145   :  { %723 = vmatpush3.bf16.msra.mxu1 %v778_v59 }
 0x146   :  { %724 = vmatprep.subr.bf16.mxu1 %v884_v25 }
 0x149   :  { %725 = vmatpush3.bf16.msra.mxu1 %v779_v8 }
 0x14a   :  { %726 = vmatprep.subr.bf16.mxu1 %v884_v25 }
 0x14d   :  { %727 = vmatpush3.bf16.msra.mxu1 %v780_v9 }
 0x203   :  { %v668_v60 = vpop.f32.mrb[0].mxu1 }
 0x204   :  { %v669_v62 = vpop.f32.mrb[1].mxu1 }
 0x205   :  { %v670_v63 = vadd.f32 %v669_v62, %v668_v60  ;;  %v671_v0 = vpop.f32.mrb[2].mxu1 }
 0x206   :  { %v672_v1 = vpop.f32.mrb[3].mxu1 }
 0x207   :  { %v350_v2 = vadd.f32 %v670_v63, %v608_v61  ;;  %v673_v3 = vadd.f32 %v672_v1, %v671_v0 }
 0x209   :  { %v353_v4 = vadd.f32 %v673_v3, %v608_v61  ;;  %v356_v5 = vmax.f32 %v350_v2, 0.0 }
 0x20b   :  { %v357_v6 = vmax.f32 %v353_v4, 0.0 }
 0x20d   :  { %v358_v7 = vpack.c.bf16 %v357_v6, %v356_v5 }
 0x20f   :  { %709 = vmatmul.mubr.bf16.vlgmr.msra.gmra.mrb[4].mxu0 %v358_v7 }
 0x2e2   :  { %v464_v11 = vpop.f32.mrb[4].mxu0 }
 0x2e3   :  { %v465_v12 = vadd.f32 %v625_v10, %v464_v11  ;;  %v710_v13 = vpop.f32.mrb[5].mxu0 }
 0x2e4   :  { %v467_v14 = vpop.f32.mrb[6].mxu0 }
 0x2e5   :  { %v468_v15 = vadd.f32 %v625_v10, %v467_v14  ;;  %v711_v16 = vpop.f32.mrb[7].mxu0  ;;  %v471_v17 = vmax.f32 %v465_v12, 0.0 }
 0x2e7   :  { %v472_v18 = vmax.f32 %v468_v15, 0.0 }
 0x2e9   :  { %v473_v19 = vpack.c.bf16 %v472_v18, %v471_v17 }
 0x2eb   :  { %729 = vmatmul.mubr.bf16.vlgmr.msra.gmra.mrb[4].mxu1 %v473_v19 }
 0x3be   :  { %v579_v21 = vpop.f32.mrb[4].mxu1 }
 0x3bf   :  { %v730_v22 = vpop.f32.mrb[5].mxu1  ;;  %v580_v24 = vadd.f32 %v634_v20, %v579_v21 }
 0x3c0   :  { %v582_v23 = vpop.f32.mrb[6].mxu1 }
 0x3c1   :  { %v583_v25 = vadd.f32 %v634_v20, %v582_v23  ;;  %v731_v26 = vpop.f32.mrb[7].mxu1 }
 0x3c3   :  { %v650_v27 = vpack.c.bf16 %v583_v25, %v580_v24 }
 0x3c5   :  { %651 = vst [vmem:[%s1048_s9] sm:$0xff] %v650_v27  }
 0x3c6   :  { %600 = vsyncpa [#allocation3], 1 }
 0x3c7   :  { %601 = vsyncpa [#allocation5], 1 }
 0x3c8   :  { %602 = vsyncpa [#allocation8], 1 }

</bundles_post_ra>
